<compile_context>
chip_gen: v7x
topology: tpu7x:2x2x1
jax: 0.10.0
libtpu: 0.0.40
codegen_flags: <defaults>
</compile_context>

<pallas_src>
import jax
import jax.numpy as jnp
from jax.experimental import pallas as pl
from jax.experimental.pallas import tpu as pltpu


def attention_fusion_kernel(seq_ref, struct_ref, w_ref, wb_ref, v_ref, out_ref):
    # seq_ref / struct_ref : (TB, S, H)  f32
    # w_ref                : (2H, F)     bf16  (resident; = [W_seq^T ; W_struct^T])
    # wb_ref               : (1, F)      f32
    # v_ref                : (1, F)      f32
    # out_ref              : (TB, 2H)    f32
    #
    # NOTE: when B % TB != 0 the trailing rows of the edge block compute on padded /
    # stale VMEM.  Every reduction below is per-batch-row and the out-of-range output
    # rows are dropped by the masked writeback, so results are unaffected.
    tb, S, H = seq_ref.shape
    F_ = w_ref.shape[1]

    seq3 = seq_ref[...]                                          # (TB, S, H)
    struct3 = struct_ref[...]                                    # (TB, S, H)

    # One in-VMEM lane-concat serves both the merged K=2H matmul operand and the
    # final attention-weighted sum; the (B, S, 2H) concat never exists in HBM.
    combined3 = jnp.concatenate([seq3, struct3], axis=-1)        # (TB, S, 2H) f32
    combined2 = combined3.reshape(tb * S, 2 * H)                 # collapse leading dims

    # energy = tanh(combined @ W^T + b_W).  Single K=2H MXU dot, bf16 operands,
    # f32 accumulate (halves vmatmul count and doubles K fill vs two K=H dots).
    # NOTE(v5e): tanh over (TB*S, F) runs on the single f32-only EUP; if it binds
    # there, shrink tb (more grid steps, DMA hides them) rather than the matmul tile.
    energy = jnp.tanh(
        jnp.dot(combined2.astype(jnp.bfloat16), w_ref[...],
                preferred_element_type=jnp.float32)
        + wb_ref[...]
    )                                                            # (TB*S, F) f32

    # scores = energy @ V^T : output N=1, so VPU multiply + lane reduce (an MXU dot
    # would be wasted).  V's bias is a uniform shift on the pre-softmax scores and
    # cancels exactly in the softmax, so it is dropped entirely.
    scores = jnp.sum(energy.reshape(tb, S, F_) * v_ref[...],
                     axis=-1, keepdims=True)                     # (TB, S, 1)

    # softmax over the sequence axis (PyTorch dim=1), per batch row.  Denominator is
    # a tiny (TB, 1, 1) tensor -> exact reciprocal keeps full f32 accuracy for free.
    m = jnp.max(scores, axis=1, keepdims=True)                   # (TB, 1, 1)
    e = jnp.exp(scores - m)                                      # (TB, S, 1)
    inv_denom = 1.0 / jnp.sum(e, axis=1, keepdims=True)          # (TB, 1, 1)
    attn = e * inv_denom                                         # (TB, S, 1)

    # fused = sum_s attn * combined  ->  single dense (TB, 2H) store.
    out_ref[...] = jnp.sum(attn * combined3, axis=1).astype(out_ref.dtype)


def _vmem_limit_bytes():
    """Per-generation scoped-VMEM limit with headroom (v5e/v6e: 128 MiB, v7x: 64 MiB)."""
    try:
        cap = pltpu.get_tpu_info().vmem_capacity_bytes
    except Exception:
        cap = 64 << 20          # conservative (v7x-sized) fallback
    # ~30% headroom for compiler temps / double-buffer slack; never ask for >96 MiB.
    return int(min(int(cap * 0.70), 96 << 20))


def _pick_batch_block(B, S, H, F_, vmem_limit):
    """Grow tb toward the VMEM budget, accounting for the f32 energy intermediate."""
    # Per-batch-row VMEM footprint (bytes) of one grid step:
    #   2 inputs x 2 pipeline buffers x (S, H) f32          -> S * 16H
    #   (S, 2H) f32 combined + (S, 2H) bf16 matmul operand  -> S * (8H + 4H)
    #   (S, F)  f32 energy intermediate                     -> S * 4F
    #   2 pipeline buffers x (2H,) f32 output               -> 16H
    per_row = S * (16 * H + 8 * H + 4 * H + 4 * F_) + 16 * H
    budget = int(vmem_limit * 0.75)          # leave room for resident weights / temps
    tb = max(8, budget // max(per_row, 1))
    tb = min(tb, B)
    # Keep >= 2 grid steps when B is large enough: lets the single "parallel" batch
    # axis split across v7x's two TensorCores and keeps the BlockSpec pipeline busy.
    if B >= 16:
        half = ((-(-B // 2) + 7) // 8) * 8
        tb = min(tb, half)
    if tb < B:
        tb = max(8, (tb // 8) * 8)           # sublane-aligned edge blocks
    return max(1, tb)


def attention_fusion(seq_embed, struct_embed, w_weight, w_bias, v_weight, v_bias,
                     *, tb=None):
    """seq_embed, struct_embed: (B, S, H) float32.
    w_weight: (F, 2H), w_bias: (F,), v_weight: (1, F), v_bias: (1,)  (PyTorch nn.Linear
    layout).  Returns fused: (B, 2H) float32.  v_bias is accepted for API parity but is
    mathematically irrelevant (uniform pre-softmax shift)."""
    B, S, H = seq_embed.shape
    F_ = w_weight.shape[0]
    assert w_weight.shape == (F_, 2 * H)
    del v_bias  # cancels exactly in softmax

    # Single resident (2H, F) weight = W^T; bf16 since it only feeds the MXU.
    w_cat = jnp.asarray(w_weight.T, dtype=jnp.bfloat16)          # (2H, F)
    wb = jnp.asarray(w_bias, dtype=jnp.float32).reshape(1, F_)
    v_row = jnp.asarray(v_weight, dtype=jnp.float32).reshape(1, F_)

    vmem_limit = _vmem_limit_bytes()
    if tb is None:
        tb = _pick_batch_block(B, S, H, F_, vmem_limit)
    tb = max(1, min(tb, B))
    grid_b = pl.cdiv(B, tb)

    # If profiling shows exposed DMA at large tb, add pipeline_mode=pl.Buffered(3) on
    # the two big input specs (keep 2 on v7x where VMEM is tight).
    out = pl.pallas_call(
        attention_fusion_kernel,
        out_shape=jax.ShapeDtypeStruct((B, 2 * H), jnp.float32),
        grid_spec=pltpu.PrefetchScalarGridSpec(
            num_scalar_prefetch=0,
            grid=(grid_b,),
            in_specs=[
                pl.BlockSpec((tb, S, H), lambda b: (b, 0, 0)),       # seq
                pl.BlockSpec((tb, S, H), lambda b: (b, 0, 0)),       # struct
                pl.BlockSpec((2 * H, F_), lambda b: (0, 0)),         # W^T (resident)
                pl.BlockSpec((1, F_), lambda b: (0, 0)),             # W bias
                pl.BlockSpec((1, F_), lambda b: (0, 0)),             # V row
            ],
            out_specs=pl.BlockSpec((tb, 2 * H), lambda b: (b, 0)),
        ),
        compiler_params=pltpu.CompilerParams(
            dimension_semantics=("parallel",),
            vmem_limit_bytes=vmem_limit,
        ),
    )(seq_embed, struct_embed, w_cat, wb, v_row)
    return out


def attention_fusion_ref(seq_embed, struct_embed, w_weight, w_bias, v_weight, v_bias):
    combined = jnp.concatenate([seq_embed, struct_embed], axis=-1)
    energy = jnp.tanh(jnp.einsum("bsh,fh->bsf", combined, w_weight) + w_bias)
    scores = jnp.einsum("bsf,of->bso", energy, v_weight) + v_bias
    attention = jax.nn.softmax(scores, axis=1)
    return jnp.sum(attention * combined, axis=1)


if __name__ == "__main__":
    # Small, deterministic synthetic setup (PyTorch nn.Linear shapes).
    B, S, H = 2, 8, 32
    fusion_size = 128

    key = jax.random.PRNGKey(0)
    k1, k2, k3, k4, k5, k6 = jax.random.split(key, 6)

    seq_embed = jax.random.normal(k1, (B, S, H), dtype=jnp.float32)
    struct_embed = jax.random.normal(k2, (B, S, H), dtype=jnp.float32)

    w_weight = jax.random.normal(k3, (fusion_size, 2 * H), dtype=jnp.float32) * 0.1
    w_bias = jax.random.normal(k4, (fusion_size,), dtype=jnp.float32) * 0.1
    v_weight = jax.random.normal(k5, (1, fusion_size), dtype=jnp.float32) * 0.1
    v_bias = jax.random.normal(k6, (1,), dtype=jnp.float32) * 0.1

    fused = attention_fusion(seq_embed, struct_embed, w_weight, w_bias, v_weight, v_bias)
    fused = jax.block_until_ready(fused)

    ref = attention_fusion_ref(seq_embed, struct_embed, w_weight, w_bias, v_weight, v_bias)
    assert fused.shape == (B, 2 * H)
    # Tolerance covers the bf16 MXU operands in the energy matmul; tanh, softmax
    # (exact reciprocal) and the weighted sum are all f32.
    assert jnp.allclose(fused, ref, atol=3e-2, rtol=3e-2), "mismatch vs pure-JAX reference"

    print("KERNEL_OK")
</pallas_src>

<mosaic_0001>
module attributes {stable_mosaic.version = 11 : i64} {
  func.func @attention_fusion_kernel(%arg0: i32, %arg1: memref<2x8x32xf32, #tpu.memory_space<vmem>>, %arg2: memref<2x8x32xf32, #tpu.memory_space<vmem>>, %arg3: memref<64x128xbf16, #tpu.memory_space<vmem>>, %arg4: memref<1x128xf32, #tpu.memory_space<vmem>>, %arg5: memref<1x128xf32, #tpu.memory_space<vmem>>, %arg6: memref<2x64xf32, #tpu.memory_space<vmem>>) attributes {dimension_semantics = [#tpu.dimension_semantics<parallel>], iteration_bounds = array<i64: 1>, scalar_prefetch = 0 : i64, scratch_operands = 0 : i64, tpu.core_type = #tpu.core_type<tc>, window_params = [{transform_indices = @transform_0, window_bounds = array<i64: 2, 8, 32>}, {transform_indices = @transform_1, window_bounds = array<i64: 2, 8, 32>}, {pipeline_mode = #tpu.pipeline_mode<synchronous>, transform_indices = @transform_2, window_bounds = array<i64: 64, 128>}, {pipeline_mode = #tpu.pipeline_mode<synchronous>, transform_indices = @transform_3, window_bounds = array<i64: 1, 128>}, {pipeline_mode = #tpu.pipeline_mode<synchronous>, transform_indices = @transform_4, window_bounds = array<i64: 1, 128>}, {transform_indices = @transform_5, window_bounds = array<i64: 2, 64>}]} {
    %c0 = arith.constant 0 : index
    %c0_0 = arith.constant 0 : index
    %c0_1 = arith.constant 0 : index
    %0 = vector.load %arg1[%c0, %c0_0, %c0_1] : memref<2x8x32xf32, #tpu.memory_space<vmem>>, vector<2x8x32xf32>
    %c0_2 = arith.constant 0 : index
    %c0_3 = arith.constant 0 : index
    %c0_4 = arith.constant 0 : index
    %1 = vector.load %arg2[%c0_2, %c0_3, %c0_4] : memref<2x8x32xf32, #tpu.memory_space<vmem>>, vector<2x8x32xf32>
    %2 = tpu.concatenate %0, %1 in 2 : vector<2x8x32xf32>, vector<2x8x32xf32> -> vector<2x8x64xf32>
    %3 = vector.shape_cast %2 : vector<2x8x64xf32> to vector<16x64xf32>
    %4 = arith.truncf %3 : vector<16x64xf32> to vector<16x64xbf16>
    %c0_5 = arith.constant 0 : index
    %c0_6 = arith.constant 0 : index
    %5 = vector.load %arg3[%c0_5, %c0_6] : memref<64x128xbf16, #tpu.memory_space<vmem>>, vector<64x128xbf16>
    %cst = arith.constant dense<0.000000e+00> : vector<16x128xf32>
    %6 = tpu.matmul %4, %5, %cst {dimension_numbers = #tpu.dot_dimension_numbers<[1], [0], [0], [1], [0, 0, 1, 1], [], []>} : vector<16x64xbf16>, vector<64x128xbf16>, vector<16x128xf32> -> vector<16x128xf32>
    %c0_7 = arith.constant 0 : index
    %c0_8 = arith.constant 0 : index
    %7 = vector.load %arg4[%c0_7, %c0_8] : memref<1x128xf32, #tpu.memory_space<vmem>>, vector<1x128xf32>
    %8 = vector.broadcast %7 : vector<1x128xf32> to vector<16x128xf32>
    %9 = arith.addf %6, %8 : vector<16x128xf32>
    %10 = math.tanh %9 : vector<16x128xf32>
    %11 = vector.shape_cast %10 : vector<16x128xf32> to vector<2x8x128xf32>
    %c0_9 = arith.constant 0 : index
    %c0_10 = arith.constant 0 : index
    %12 = vector.load %arg5[%c0_9, %c0_10] : memref<1x128xf32, #tpu.memory_space<vmem>>, vector<1x128xf32>
    %13 = vector.shape_cast %12 : vector<1x128xf32> to vector<1x1x128xf32>
    %14 = vector.broadcast %13 : vector<1x1x128xf32> to vector<2x8x128xf32>
    %15 = arith.mulf %11, %14 : vector<2x8x128xf32>
    %cst_11 = arith.constant dense<0.000000e+00> : vector<2x8xf32>
    %16 = vector.multi_reduction <add>, %15, %cst_11 [2] : vector<2x8x128xf32> to vector<2x8xf32>
    %17 = vector.shape_cast %16 : vector<2x8xf32> to vector<2x8x1xf32>
    %cst_12 = arith.constant dense<0xFF800000> : vector<2x1xf32>
    %18 = vector.multi_reduction <maximumf>, %17, %cst_12 [1] : vector<2x8x1xf32> to vector<2x1xf32>
    %19 = vector.shape_cast %18 : vector<2x1xf32> to vector<2x1x1xf32>
    %20 = vector.broadcast %19 : vector<2x1x1xf32> to vector<2x8x1xf32>
    %21 = arith.subf %17, %20 : vector<2x8x1xf32>
    %22 = math.exp %21 : vector<2x8x1xf32>
    %cst_13 = arith.constant dense<0.000000e+00> : vector<2x1xf32>
    %23 = vector.multi_reduction <add>, %22, %cst_13 [1] : vector<2x8x1xf32> to vector<2x1xf32>
    %24 = vector.shape_cast %23 : vector<2x1xf32> to vector<2x1x1xf32>
    %cst_14 = arith.constant 1.000000e+00 : f32
    %25 = vector.broadcast %cst_14 : f32 to vector<2x1x1xf32>
    %26 = arith.divf %25, %24 : vector<2x1x1xf32>
    %27 = vector.broadcast %26 : vector<2x1x1xf32> to vector<2x8x1xf32>
    %28 = arith.mulf %22, %27 : vector<2x8x1xf32>
    %29 = vector.broadcast %28 : vector<2x8x1xf32> to vector<2x8x64xf32>
    %30 = arith.mulf %29, %2 : vector<2x8x64xf32>
    %cst_15 = arith.constant dense<0.000000e+00> : vector<2x64xf32>
    %31 = vector.multi_reduction <add>, %30, %cst_15 [1] : vector<2x8x64xf32> to vector<2x64xf32>
    %c0_16 = arith.constant 0 : index
    %c0_17 = arith.constant 0 : index
    %32 = vector.load %arg6[%c0_16, %c0_17] : memref<2x64xf32, #tpu.memory_space<vmem>>, vector<2x64xf32>
    tpu.vector_store %arg6[%c0_16, %c0_17], %31 {strides = array<i32>} : memref<2x64xf32, #tpu.memory_space<vmem>>, vector<2x64xf32>,
    return
  }
  func.func @transform_0(%arg0: i32) -> (i32, i32, i32) {
    %c0_i32 = arith.constant 0 : i32
    %c0_i32_0 = arith.constant 0 : i32
    %c0_i32_1 = arith.constant 0 : i32
    return %arg0, %c0_i32, %c0_i32_0 : i32, i32, i32
  }
  func.func @transform_1(%arg0: i32) -> (i32, i32, i32) {
    %c0_i32 = arith.constant 0 : i32
    %c0_i32_0 = arith.constant 0 : i32
    %c0_i32_1 = arith.constant 0 : i32
    return %arg0, %c0_i32, %c0_i32_0 : i32, i32, i32
  }
  func.func @transform_2(%arg0: i32) -> (i32, i32) {
    %c0_i32 = arith.constant 0 : i32
    %c0_i32_0 = arith.constant 0 : i32
    %c0_i32_1 = arith.constant 0 : i32
    return %c0_i32, %c0_i32_0 : i32, i32
  }
  func.func @transform_3(%arg0: i32) -> (i32, i32) {
    %c0_i32 = arith.constant 0 : i32
    %c0_i32_0 = arith.constant 0 : i32
    %c0_i32_1 = arith.constant 0 : i32
    return %c0_i32, %c0_i32_0 : i32, i32
  }
  func.func @transform_4(%arg0: i32) -> (i32, i32) {
    %c0_i32 = arith.constant 0 : i32
    %c0_i32_0 = arith.constant 0 : i32
    %c0_i32_1 = arith.constant 0 : i32
    return %c0_i32, %c0_i32_0 : i32, i32
  }
  func.func @transform_5(%arg0: i32) -> (i32, i32) {
    %c0_i32 = arith.constant 0 : i32
    %c0_i32_0 = arith.constant 0 : i32
    return %arg0, %c0_i32 : i32, i32
  }
}

</mosaic_0001>

<bundles_post_ra>
// kernel: tpu_custom_call.1
= control target key start
LH: loop header
LB: loop body
LE: loop exit
PB: predicated region body
PF: predicated region fallthrough
CT: control target
= control target key end

     0   :  { %10 = vsyncpa [#allocation3], 0  ;;  %s507_s0 = inlined_call_operand.hbm [shape: f32[2,8,32], index: 0, kind: input, shape index: {}]   ;;  %s508_s1 = inlined_call_operand.hbm [shape: f32[2,8,32], index: 1, kind: input, shape index: {}]   ;;  %s509_s2 = inlined_call_operand.hbm [shape: bf16[64,128], index: 2, kind: input, shape index: {}]   ;;  %s510_s3 = inlined_call_operand.vmem [shape: f32[1,128], index: 3, kind: input, shape index: {}]   ;;  %s511_s4 = inlined_call_operand.vmem [shape: f32[1,128], index: 4, kind: input, shape index: {}]   ;;  %s512_s5 = inlined_call_operand.hbm [shape: f32[2,64], index: 5, kind: output, shape index: {}]  }
   0x1   :  { %11 = vsyncpa [#allocation6], 0 }
   0x2   :  { %12 = vsyncpa [#allocation4], 0  ;;  %s398_s18 = smov [#allocation5]   ;;  %s399_s20 = smov [#allocation2]  }
   0x3   :  { %s30_s19 = sshll.u32 %s398_s18, 4  ;;  %s18_s21 = sshll.u32 %s399_s20, 4  ;;  %s31_s19 = int_to_ptr.vmem [resolvable:$true] %s30_s19  ;;  %s439_s21 = int_to_ptr.vmem [resolvable:$true] %s18_s21 }
   0x4   :  { %s304_s24 = scalar_lea.hbm %s508_s1, 256 }
   0x5   :  { %p305_p0 = scmp.ne.s32.totalorder %s508_s1, %s304_s24  ;;  %p308_p1 = scmp.lt.u32.totalorder %s304_s24, %s508_s1 }
   0x7   :  { %p310_p2 = pnand %p308_p1, %p305_p0 }
   0x9   :  { %313 = shalt.err (!%p310_p2)
}
   0xa   :  { %s314_s29 = scalar_lea.vmem %s31_s19, 256  ;;  %p319_p4 = scmp.lt.s32.totalorder %s31_s19, %s31_s19 }
   0xb   :  { %p315_p3 = scmp.ne.s32.totalorder %s31_s19, %s314_s29  ;;  %p320_p5 = scmp.lt.s32.totalorder %s314_s29, %s314_s29 }
   0xd   :  { %p321_p6 = por %p320_p5, %p319_p4 }
   0xf   :  { %p322_p7 = pnand %p321_p6, %p315_p3 }
  0x11   :  { %325 = shalt.err (!%p322_p7)
}
  0x12   :  { %s400_s30 = smov 128   ;;  %s401_s6 = smov 8  }
  0x13   :  { %36 = dma.hbm_to_vmem [thread:$0]  %s508_s1, 256, %s31_s19, [#allocation6], %s400_s30, %s400_s30, %s401_s6  }
  0x14   :  { %s326_s11 = scalar_lea.hbm %s507_s0, 256 }
  0x15   :  { %p327_p8 = scmp.ne.s32.totalorder %s507_s0, %s326_s11  ;;  %p330_p9 = scmp.lt.u32.totalorder %s326_s11, %s507_s0 }
  0x17   :  { %p332_p10 = pnand %p330_p9, %p327_p8 }
  0x19   :  { %335 = shalt.err (!%p332_p10)
}
  0x1a   :  { %s336_s16 = scalar_lea.vmem %s439_s21, 256  ;;  %p341_p12 = scmp.lt.s32.totalorder %s439_s21, %s439_s21 }
  0x1b   :  { %p337_p11 = scmp.ne.s32.totalorder %s439_s21, %s336_s16  ;;  %p342_p13 = scmp.lt.s32.totalorder %s336_s16, %s336_s16 }
  0x1d   :  { %p343_p0 = por %p342_p13, %p341_p12 }
  0x1f   :  { %p344_p1 = pnand %p343_p0, %p337_p11 }
  0x21   :  { %347 = shalt.err (!%p344_p1)
}
  0x22   :  { %24 = dma.hbm_to_vmem [thread:$0]  %s507_s0, 256, %s439_s21, [#allocation3], %s400_s30, %s400_s30, %s401_s6  }
  0x23   :  { %s402_s18 = smov [#allocation7]   ;;  %s348_s23 = scalar_lea.hbm %s509_s2, 512 }
  0x24   :  { %s42_s19 = sshll.u32 %s402_s18, 4  ;;  %p349_p2 = scmp.ne.s32.totalorder %s509_s2, %s348_s23  ;;  %s43_s19 = int_to_ptr.vmem [resolvable:$true] %s42_s19 }
  0x25   :  { %p352_p3 = scmp.lt.u32.totalorder %s348_s23, %s509_s2 }
  0x27   :  { %p354_p4 = pnand %p352_p3, %p349_p2 }
  0x29   :  { %357 = shalt.err (!%p354_p4)
}
  0x2a   :  { %s358_s28 = scalar_lea.vmem %s43_s19, 512  ;;  %p363_p6 = scmp.lt.s32.totalorder %s43_s19, %s43_s19 }
  0x2b   :  { %p359_p5 = scmp.ne.s32.totalorder %s43_s19, %s358_s28  ;;  %p364_p7 = scmp.lt.s32.totalorder %s358_s28, %s358_s28 }
  0x2d   :  { %p365_p8 = por %p364_p7, %p363_p6 }
  0x2f   :  { %p366_p9 = pnand %p365_p8, %p359_p5 }
  0x31   :  { %369 = shalt.err (!%p366_p9)
}
  0x32   :  { %s403_s0 = smov 64   ;;  %s404_s21 = smov 4  }
  0x33   :  { %48 = dma.hbm_to_vmem [thread:$0]  %s509_s2, 512, %s43_s19, [#allocation6], %s403_s0, %s403_s0, %s404_s21  }
  0x34   :  { %392 = dma.done.wait [#allocation3], 256  }
  0x35   :  { %393 = vsyncadd [#allocation3], 4294967040 }
  0x36   :  { %394 = dma.done.wait [#allocation6], 768  }
  0x37   :  { %395 = vsyncadd [#allocation6], 4294966528  ;;  %v405_v0 = vmov 0.0   ;;  %vm406_vm0 = vmmov 0   ;;  %v65_v1 = vld [vmem:[#allocation5] sm:$0xff]  ;;  %s407_s6 = smov 32  }
  0x38   :  { %265 = vmatprep.subr.bf16.mxu0 %v405_v0  ;;  %273 = vmatprep.mubr.msk.bf16.mxu0 %vm406_vm0, %v405_v0  ;;  %v288_v2 = vld [vmem:[#allocation7] sm:$0xff]   ;;  %v66_v3 = vld [vmem:[#allocation5 + $0x8] sm:$0xff]  ;;  %v289_v4 = vld [vmem:[#allocation7 + $0x8] sm:$0xff]   ;;  %vm75_vm1 = vcmask 261120   ;;  %vm118_vm2 = vcmask 523264   ;;  %vm232_vm3 = vcmask 1041409  }
  0x39   :  { %69 = vrot.lane.b32.xlu0 %v65_v1, %s407_s6  ;;  %266 = vmatpush3.bf16.msra.mxu0 %v288_v2  ;;  %v290_v5 = vld [vmem:[#allocation7 + $0x10] sm:$0xff]   ;;  %v291_v6 = vld [vmem:[#allocation7 + $0x18] sm:$0xff]   ;;  %v63_v8 = vld [vmem:[#allocation2] sm:$0xff]  ;;  %vm235_vm4 = vcmask 517120  }
  0x3a   :  { %267 = vmatprep.subr.bf16.mxu0 %v405_v0  ;;  %v64_v9 = vld [vmem:[#allocation2 + $0x8] sm:$0xff]  ;;  %v253_v14 = vld [vmem:[%s510_s3] ss:$0 sm:$0xff]  ;;  %s408_s3 = smov [#allocation8]  }
  0x3b   :  { %v259_v21 = vld [vmem:[%s511_s4] ss:$0 sm:$0xff]  ;;  %s243_s4 = sshll.u32 %s408_s3, 4  ;;  %s244_s4 = int_to_ptr.vmem [resolvable:$true] %s243_s4 }
  0x3c   :  { %s370_s10 = scalar_lea.vmem %s244_s4, 32  ;;  %p375_p11 = scmp.lt.s32.totalorder %s244_s4, %s244_s4 }
  0x3d   :  { %71 = vrot.lane.b32.xlu0 %v66_v3, %s407_s6  ;;  %268 = vmatpush3.bf16.msra.mxu0 %v289_v4  ;;  %p371_p10 = scmp.ne.s32.totalorder %s244_s4, %s370_s10  ;;  %p376_p12 = scmp.lt.s32.totalorder %s370_s10, %s370_s10 }
  0x3e   :  { %269 = vmatprep.subr.bf16.mxu0 %v405_v0 }
  0x3f   :  { %p377_p13 = por %p376_p12, %p375_p11 }
  0x41   :  { %270 = vmatpush3.bf16.msra.mxu0 %v290_v5  ;;  %p378_p0 = pnand %p377_p13, %p371_p10 }
  0x42   :  { %271 = vmatprep.subr.bf16.mxu0 %v405_v0 }
  0x45   :  { %272 = vmatpush3.bf16.msra.mxu0 %v291_v6 }
  0xab   :  { %v70_v7 = vpop.permute.xlu0 %69 }
  0xac   :  { %v76_v11 = vsel %vm75_vm1, %v63_v8, %v70_v7 }
  0xaf   :  { %v72_v10 = vpop.permute.xlu0 %71 }
  0xb0   :  { %v482_v12 = vsel %vm75_vm1, %v64_v9, %v72_v10 }
  0xb1   :  { %v78_v13 = vpack.c.bf16 %v482_v12, %v76_v11 }
  0xb3   :  { %274 = vmatmul.mubr.msk.bf16.vlgmr.msra.gmra.mrb[0].mxu0 %vm118_vm2, %v78_v13 }
 0x186   :  { %v156_v15 = vpop.f32.mrb[0].mxu0 }
 0x187   :  { %v157_v16 = vadd.f32 %v253_v14, %v156_v15  ;;  %v275_v17 = vpop.f32.mrb[1].mxu0 }
 0x188   :  { %v159_v18 = vpop.f32.mrb[2].mxu0 }
 0x189   :  { %292 = vtanh.f32 %v157_v16  ;;  %v160_v19 = vadd.f32 %v253_v14, %v159_v18  ;;  %v276_v20 = vpop.f32.mrb[3].mxu0 }
 0x18b   :  { %294 = vtanh.f32 %v160_v19 }
 0x193   :  { %v293_v22 = vpop.eup %292 }
 0x194   :  { %v172_v23 = vmul.f32 %v293_v22, %v259_v21 }
 0x195   :  { %v295_v24 = vpop.eup %294 }
 0x196   :  { %174 = vadd.xlane.f32.xlu1 %v172_v23  ;;  %v173_v25 = vmul.f32 %v295_v24, %v259_v21 }
 0x19a   :  { %176 = vadd.xlane.f32.xlu1 %v173_v25 }
 0x223   :  { %v175_v26 = vpop.xlane.xlu1 %174 }
 0x224   :  { %v178_v27 = vrot.slane %v175_v26, 4 }
 0x226   :  { %v179_v28 = vmax.f32 %v175_v26, %v178_v27 }
 0x227   :  { %v177_v29 = vpop.xlane.xlu1 %176 }
 0x228   :  { %v180_v30 = vrot.slane %v179_v28, 2  ;;  %v184_v31 = vrot.slane %v177_v29, 4 }
 0x22a   :  { %v181_v32 = vmax.f32 %v179_v28, %v180_v30  ;;  %v185_v33 = vmax.f32 %v177_v29, %v184_v31 }
 0x22c   :  { %v182_v34 = vrot.slane %v181_v32, 1  ;;  %v186_v35 = vrot.slane %v185_v33, 2 }
 0x22e   :  { %v183_v36 = vmax.f32 %v181_v32, %v182_v34  ;;  %v187_v37 = vmax.f32 %v185_v33, %v186_v35 }
 0x230   :  { %v190_v38 = vsub.f32 %v175_v26, %v183_v36  ;;  %v188_v39 = vrot.slane %v187_v37, 1 }
 0x232   :  { %v192_v40 = vmul.f32 1.442695, %v190_v38  ;;  %v189_v41 = vmax.f32 %v187_v37, %v188_v39 }
 0x234   :  { %296 = vpow2.f32 %v192_v40  ;;  %v191_v42 = vsub.f32 %v177_v29, %v189_v41 }
 0x236   :  { %v194_v43 = vmul.f32 1.442695, %v191_v42 }
 0x238   :  { %298 = vpow2.f32 %v194_v43 }
 0x23e   :  { %v297_v44 = vpop.eup %296 }
 0x23f   :  { %v196_v45 = vrot.slane %v297_v44, 4 }
 0x241   :  { %v197_v46 = vadd.f32 %v297_v44, %v196_v45 }
 0x242   :  { %v299_v47 = vpop.eup %298 }
 0x243   :  { %v198_v48 = vrot.slane %v197_v46, 2  ;;  %v202_v49 = vrot.slane %v299_v47, 4 }
 0x245   :  { %v203_v50 = vadd.f32 %v299_v47, %v202_v49  ;;  %v199_v51 = vadd.f32 %v198_v48, %v197_v46 }
 0x247   :  { %v204_v52 = vrot.slane %v203_v50, 2  ;;  %v200_v53 = vrot.slane %v199_v51, 1 }
 0x249   :  { %v205_v54 = vadd.f32 %v204_v52, %v203_v50  ;;  %v201_v55 = vadd.f32 %v200_v53, %v199_v51 }
 0x24b   :  { %v206_v56 = vrot.slane %v205_v54, 1  ;;  %300 = vrcp.f32 %v201_v55 }
 0x24d   :  { %v207_v57 = vadd.f32 %v206_v56, %v205_v54 }
 0x24f   :  { %302 = vrcp.f32 %v207_v57 }
 0x255   :  { %v301_v58 = vpop.eup %300 }
 0x256   :  { %v212_v59 = vmul.f32 %v301_v58, %v297_v44 }
 0x258   :  { %v214_v60 = vmul.f32 %v212_v59, %v76_v11 }
 0x259   :  { %v303_v61 = vpop.eup %302 }
 0x25a   :  { %v213_v62 = vmul.f32 %v303_v61, %v299_v47  ;;  %v216_v63 = vsel %vm118_vm2, %v214_v60, 0.0 }
 0x25b   :  { %v217_v0 = vrot.slane %v216_v63, 4 }
 0x25c   :  { %v215_v1 = vmul.f32 %v213_v62, %v482_v12 }
 0x25d   :  { %v218_v2 = vadd.f32 %v217_v0, %v216_v63 }
 0x25e   :  { %v223_v3 = vsel %vm118_vm2, %v215_v1, 0.0 }
 0x25f   :  { %v219_v4 = vrot.slane %v218_v2, 2  ;;  %v224_v5 = vrot.slane %v223_v3, 4 }
 0x261   :  { %v220_v6 = vadd.f32 %v219_v4, %v218_v2  ;;  %v225_v7 = vadd.f32 %v224_v5, %v223_v3 }
 0x263   :  { %v226_v8 = vrot.slane %v225_v7, 2  ;;  %v221_v9 = vrot.slane %v220_v6, 1 }
 0x265   :  { %v227_v10 = vadd.f32 %v226_v8, %v225_v7  ;;  %v222_v11 = vadd.f32 %v221_v9, %v220_v6 }
 0x267   :  { %v228_v13 = vrot.slane %v227_v10, 1 }
 0x269   :  { %v229_v14 = vadd.f32 %v228_v13, %v227_v10 }
 0x26b   :  { %v233_v15 = vsel %vm232_vm3, %v229_v14, %v222_v11 }
 0x26c   :  { %236 = vst.msk [vmem:[#allocation8] sm:$0x3] %vm235_vm4, %v233_v15 }
 0x26d   :  { %381 = shalt.err (!%p378_p0)
}
 0x26e   :  { %s382_s13 = scalar_lea.hbm %s512_s5, 32 }
 0x26f   :  { %p383_p1 = scmp.ne.s32.totalorder %s512_s5, %s382_s13  ;;  %p386_p2 = scmp.lt.u32.totalorder %s382_s13, %s512_s5 }
 0x271   :  { %p388_p3 = pnand %p386_p2, %p383_p1 }
 0x273   :  { %391 = shalt.err (!%p388_p3)
}
 0x274   :  { %246 = dma.vmem_to_hbm [thread:$0]  %s244_s4, 32, %s512_s5, [#allocation4]  }
 0x275   :  { %396 = dma.done.wait [#allocation4], 32  }
 0x276   :  { %397 = vsyncadd [#allocation4], 4294967264 }
 0x277   :  { %250 = vsyncpa [#allocation3], 1 }
 0x278   :  { %251 = vsyncpa [#allocation6], 1 }
 0x279   :  { %252 = vsyncpa [#allocation4], 1 }

</bundles_post_ra>
